<compile_context>
chip_gen: v6e
topology: v6e:2x2x1
jax: 0.10.0
libtpu: 0.0.40
codegen_flags: <defaults>
</compile_context>

<pallas_src>
import functools

import jax
import jax.numpy as jnp
from jax import lax
from jax.experimental import pallas as pl
from jax.experimental.pallas import tpu as pltpu


def _msf_kernel(x_ref, w_ref, b_ref, o_ref, tap_ref, *, H, W, n_pad):
    # x_ref:   (G, R, H*W)   R = (images packed on sublanes) * C, pixels on lanes
    # w_ref:   (R, K_pad)    block-diagonal fused 5x5 weight (zero-padded columns)
    # b_ref:   (R, 1)        fused bias, tiled per packed image
    # o_ref:   (G, R, H*W)   output (lane-dense, full sublanes)
    # tap_ref: (K_pad, H*W)  VMEM im2col scratch; rows >= 25*R are zero padding
    G, R, HW = x_ref.shape

    # Zero the contraction-padding rows once; they are never written afterwards.
    if n_pad > 0:
        @pl.when(pl.program_id(0) == 0)
        def _():
            tap_ref[pl.ds(25 * R, n_pad), :] = jnp.zeros((n_pad, HW), jnp.float32)

    # 25 border-validity masks (implicit "same" zero padding), computed once per
    # invocation as 0/1 f32 so the border zeroing fuses into the tap write.
    pos = lax.broadcasted_iota(jnp.int32, (1, HW), 1)
    col = (pos & (W - 1)) if (W & (W - 1) == 0) else (pos % W)
    fmasks = []
    for ky in range(5):
        dy = ky - 2
        rlo, rhi = max(0, -dy) * W, min(H, H - dy) * W
        for kx in range(5):
            dx = kx - 2
            clo, chi = max(0, -dx), min(W, W - dx)
            ok = (pos >= rlo) & (pos < rhi) & (col >= clo) & (col < chi)
            fmasks.append(ok.astype(jnp.float32))

    w = w_ref[...]            # (R, K_pad)
    bias = b_ref[...]         # (R, 1)

    for g in range(G):        # static unroll: few fat groups per grid step
        x = x_ref[g]          # (R, HW)
        for ky in range(5):
            for kx in range(5):
                t = ky * 5 + kx
                shift = (ky - 2) * W + (kx - 2)          # flat-index shift of tap
                s = (-shift) % HW                        # jnp.roll convention
                shifted = x if s == 0 else pltpu.roll(x, s, axis=1)   # XLU
                # Full-sublane, lane-dense store into the im2col slab.
                tap_ref[pl.ds(t * R, R), :] = shifted * fmasks[t]
        # One MXU matmul does the whole tap x channel reduction for all packed
        # images at once (block-diagonal weight keeps the images independent).
        acc = jnp.dot(w, tap_ref[...], preferred_element_type=jnp.float32)
        o_ref[g] = (acc + bias).astype(o_ref.dtype)


def multi_scale_fusion(x_nchw, w1, b1, w3, b3, w5, b5):
    """x_nchw: (N, C, H, W) float32.  Weights in PyTorch layout (Cout, Cin, kH, kW)."""
    N, C, H, W = x_nchw.shape
    HW = H * W

    # --- glue: fuse the three kernels into one 5x5 kernel (exact) -------------
    w_fused = jnp.zeros((5, 5, C, C), dtype=jnp.float32)            # [ky,kx,cin,cout]
    w_fused = w_fused + jnp.transpose(w5, (2, 3, 1, 0))             # 5x5 as-is
    w_fused = w_fused.at[1:4, 1:4].add(jnp.transpose(w3, (2, 3, 1, 0)))    # 3x3 centered
    w_fused = w_fused.at[2, 2].add(jnp.transpose(w1, (2, 3, 1, 0))[0, 0])  # 1x1 centered
    b_fused = b1 + b3 + b5                                          # (C,)

    # --- pack B images onto sublanes so blocks fill (8,128) vreg tiles --------
    B = max(1, min(N, 8 // max(1, C)))
    while N % B:
        B -= 1
    R = B * C
    groups = N // B

    # Per-tap (cout, cin) weights, expanded block-diagonally over the B packed images.
    w_taps = jnp.transpose(w_fused.reshape(25, C, C), (0, 2, 1))    # (25, cout, cin)
    eye_b = jnp.eye(B, dtype=jnp.float32)
    w_full = jnp.einsum("ab,toc->aotbc", eye_b, w_taps).reshape(R, 25 * R)
    K = 25 * R
    K_pad = ((K + 127) // 128) * 128          # MXU-friendly contraction dim
    if K_pad > K:
        w_full = jnp.pad(w_full, ((0, 0), (0, K_pad - K)))
    b_full = jnp.tile(b_fused, B).reshape(R, 1)

    # Metadata-only reshape: channels of B images stacked on sublanes, pixels on lanes.
    x_packed = x_nchw.reshape(groups, R, HW)

    # Fatten grid steps so the ~0.35us per-step pipeline overhead is amortized.
    bytes_per_group = R * HW * x_nchw.dtype.itemsize
    G = max(1, min(groups, (64 * 1024) // max(1, bytes_per_group)))
    while groups % G:
        G -= 1
    # TODO(synk): on v7x prefer >=2 grid steps (2 TensorCores) when `groups` allows.

    kernel = functools.partial(_msf_kernel, H=H, W=W, n_pad=K_pad - K)

    out = pl.pallas_call(
        kernel,
        out_shape=jax.ShapeDtypeStruct((groups, R, HW), x_nchw.dtype),
        grid_spec=pltpu.PrefetchScalarGridSpec(
            num_scalar_prefetch=0,
            grid=(groups // G,),
            in_specs=[
                pl.BlockSpec((G, R, HW), lambda i: (i, 0, 0)),
                pl.BlockSpec((R, K_pad), lambda i: (0, 0)),
                pl.BlockSpec((R, 1), lambda i: (0, 0)),
            ],
            out_specs=pl.BlockSpec((G, R, HW), lambda i: (i, 0, 0)),
            scratch_shapes=[pltpu.VMEM((K_pad, HW), jnp.float32)],
        ),
        compiler_params=pltpu.CompilerParams(
            dimension_semantics=("parallel",),
            vmem_limit_bytes=32 * 1024 * 1024,
        ),
    )(x_packed, w_full, b_full)

    return out.reshape(N, C, H, W)


def _reference(x, w1, b1, w3, b3, w5, b5):
    """Plain-JAX NCHW reference matching the PyTorch module."""
    dn = ("NCHW", "OIHW", "NCHW")
    c1 = lax.conv_general_dilated(x, w1, (1, 1), "SAME", dimension_numbers=dn)
    c3 = lax.conv_general_dilated(x, w3, (1, 1), "SAME", dimension_numbers=dn)
    c5 = lax.conv_general_dilated(x, w5, (1, 1), "SAME", dimension_numbers=dn)
    return (c1 + b1[None, :, None, None]
            + c3 + b3[None, :, None, None]
            + c5 + b5[None, :, None, None])


if __name__ == "__main__":
    N, C, H, W = 2, 4, 16, 16
    key = jax.random.PRNGKey(0)
    kx, k1, k2, k3, k4, k5, k6 = jax.random.split(key, 7)

    x = jax.random.normal(kx, (N, C, H, W), dtype=jnp.float32)
    # PyTorch Conv2d weight layout: (O, I, kH, kW).
    w1 = jax.random.normal(k1, (C, C, 1, 1), dtype=jnp.float32) * 0.1
    b1 = jax.random.normal(k2, (C,), dtype=jnp.float32) * 0.1
    w3 = jax.random.normal(k3, (C, C, 3, 3), dtype=jnp.float32) * 0.1
    b3 = jax.random.normal(k4, (C,), dtype=jnp.float32) * 0.1
    w5 = jax.random.normal(k5, (C, C, 5, 5), dtype=jnp.float32) * 0.1
    b5 = jax.random.normal(k6, (C,), dtype=jnp.float32) * 0.1

    out = multi_scale_fusion(x, w1, b1, w3, b3, w5, b5)
    out = jax.block_until_ready(out)

    ref = jax.block_until_ready(_reference(x, w1, b1, w3, b3, w5, b5))
    assert out.shape == (N, C, H, W)
    assert jnp.allclose(out, ref, atol=1e-4, rtol=1e-4), "mismatch vs reference"

    print("KERNEL_OK")
</pallas_src>

<mosaic_0001>
module attributes {stable_mosaic.version = 11 : i64} {
  func.func @_msf_kernel(%arg0: i32, %arg1: memref<1x8x256xf32, #tpu.memory_space<vmem>>, %arg2: memref<8x256xf32, #tpu.memory_space<vmem>>, %arg3: memref<8x1xf32, #tpu.memory_space<vmem>>, %arg4: memref<1x8x256xf32, #tpu.memory_space<vmem>>, %arg5: memref<256x256xf32, #tpu.memory_space<vmem>>) attributes {dimension_semantics = [#tpu.dimension_semantics<parallel>], iteration_bounds = array<i64: 1>, scalar_prefetch = 0 : i64, scratch_operands = 1 : i64, tpu.core_type = #tpu.core_type<tc>, window_params = [{transform_indices = @transform_0, window_bounds = array<i64: 1, 8, 256>}, {pipeline_mode = #tpu.pipeline_mode<synchronous>, transform_indices = @transform_1, window_bounds = array<i64: 8, 256>}, {pipeline_mode = #tpu.pipeline_mode<synchronous>, transform_indices = @transform_2, window_bounds = array<i64: 8, 1>}, {transform_indices = @transform_3, window_bounds = array<i64: 1, 8, 256>}]} {
    %c0_i32 = arith.constant 0 : i32
    %0 = arith.cmpi eq, %arg0, %c0_i32 : i32
    %1 = arith.extui %0 : i1 to i32
    %c0_i32_0 = arith.constant 0 : i32
    %2 = arith.cmpi ne, %1, %c0_i32_0 : i32
    scf.if %2 {
      %cst_138 = arith.constant 0.000000e+00 : f32
      %441 = vector.broadcast %cst_138 : f32 to vector<56x256xf32>
      %c200 = arith.constant 200 : index
      %c0_139 = arith.constant 0 : index
      %442 = vector.load %arg5[%c200, %c0_139] : memref<256x256xf32, #tpu.memory_space<vmem>>, vector<56x256xf32>
      tpu.vector_store %arg5[%c200, %c0_139], %441 {strides = array<i32>} : memref<256x256xf32, #tpu.memory_space<vmem>>, vector<56x256xf32>,
    } else {
    }
    %3 = tpu.iota {dimensions = array<i32: 1>} : vector<1x256xi32>
    %c15_i32 = arith.constant 15 : i32
    %4 = vector.broadcast %c15_i32 : i32 to vector<1x256xi32>
    %5 = arith.andi %3, %4 : vector<1x256xi32>
    %c32_i32 = arith.constant 32 : i32
    %6 = vector.broadcast %c32_i32 : i32 to vector<1x256xi32>
    %7 = arith.cmpi sge, %3, %6 : vector<1x256xi32>
    %c256_i32 = arith.constant 256 : i32
    %8 = vector.broadcast %c256_i32 : i32 to vector<1x256xi32>
    %9 = arith.cmpi slt, %3, %8 : vector<1x256xi32>
    %10 = arith.andi %7, %9 : vector<1x256xi1>
    %c2_i32 = arith.constant 2 : i32
    %11 = vector.broadcast %c2_i32 : i32 to vector<1x256xi32>
    %12 = arith.cmpi sge, %5, %11 : vector<1x256xi32>
    %13 = arith.andi %10, %12 : vector<1x256xi1>
    %c16_i32 = arith.constant 16 : i32
    %14 = vector.broadcast %c16_i32 : i32 to vector<1x256xi32>
    %15 = arith.cmpi slt, %5, %14 : vector<1x256xi32>
    %16 = arith.andi %13, %15 : vector<1x256xi1>
    %17 = arith.extui %16 : vector<1x256xi1> to vector<1x256xi32>
    %18 = arith.sitofp %17 : vector<1x256xi32> to vector<1x256xf32>
    %c32_i32_1 = arith.constant 32 : i32
    %19 = vector.broadcast %c32_i32_1 : i32 to vector<1x256xi32>
    %20 = arith.cmpi sge, %3, %19 : vector<1x256xi32>
    %c256_i32_2 = arith.constant 256 : i32
    %21 = vector.broadcast %c256_i32_2 : i32 to vector<1x256xi32>
    %22 = arith.cmpi slt, %3, %21 : vector<1x256xi32>
    %23 = arith.andi %20, %22 : vector<1x256xi1>
    %c1_i32 = arith.constant 1 : i32
    %24 = vector.broadcast %c1_i32 : i32 to vector<1x256xi32>
    %25 = arith.cmpi sge, %5, %24 : vector<1x256xi32>
    %26 = arith.andi %23, %25 : vector<1x256xi1>
    %c16_i32_3 = arith.constant 16 : i32
    %27 = vector.broadcast %c16_i32_3 : i32 to vector<1x256xi32>
    %28 = arith.cmpi slt, %5, %27 : vector<1x256xi32>
    %29 = arith.andi %26, %28 : vector<1x256xi1>
    %30 = arith.extui %29 : vector<1x256xi1> to vector<1x256xi32>
    %31 = arith.sitofp %30 : vector<1x256xi32> to vector<1x256xf32>
    %c32_i32_4 = arith.constant 32 : i32
    %32 = vector.broadcast %c32_i32_4 : i32 to vector<1x256xi32>
    %33 = arith.cmpi sge, %3, %32 : vector<1x256xi32>
    %c256_i32_5 = arith.constant 256 : i32
    %34 = vector.broadcast %c256_i32_5 : i32 to vector<1x256xi32>
    %35 = arith.cmpi slt, %3, %34 : vector<1x256xi32>
    %36 = arith.andi %33, %35 : vector<1x256xi1>
    %c0_i32_6 = arith.constant 0 : i32
    %37 = vector.broadcast %c0_i32_6 : i32 to vector<1x256xi32>
    %38 = arith.cmpi sge, %5, %37 : vector<1x256xi32>
    %39 = arith.andi %36, %38 : vector<1x256xi1>
    %c16_i32_7 = arith.constant 16 : i32
    %40 = vector.broadcast %c16_i32_7 : i32 to vector<1x256xi32>
    %41 = arith.cmpi slt, %5, %40 : vector<1x256xi32>
    %42 = arith.andi %39, %41 : vector<1x256xi1>
    %43 = arith.extui %42 : vector<1x256xi1> to vector<1x256xi32>
    %44 = arith.sitofp %43 : vector<1x256xi32> to vector<1x256xf32>
    %c32_i32_8 = arith.constant 32 : i32
    %45 = vector.broadcast %c32_i32_8 : i32 to vector<1x256xi32>
    %46 = arith.cmpi sge, %3, %45 : vector<1x256xi32>
    %c256_i32_9 = arith.constant 256 : i32
    %47 = vector.broadcast %c256_i32_9 : i32 to vector<1x256xi32>
    %48 = arith.cmpi slt, %3, %47 : vector<1x256xi32>
    %49 = arith.andi %46, %48 : vector<1x256xi1>
    %c0_i32_10 = arith.constant 0 : i32
    %50 = vector.broadcast %c0_i32_10 : i32 to vector<1x256xi32>
    %51 = arith.cmpi sge, %5, %50 : vector<1x256xi32>
    %52 = arith.andi %49, %51 : vector<1x256xi1>
    %c15_i32_11 = arith.constant 15 : i32
    %53 = vector.broadcast %c15_i32_11 : i32 to vector<1x256xi32>
    %54 = arith.cmpi slt, %5, %53 : vector<1x256xi32>
    %55 = arith.andi %52, %54 : vector<1x256xi1>
    %56 = arith.extui %55 : vector<1x256xi1> to vector<1x256xi32>
    %57 = arith.sitofp %56 : vector<1x256xi32> to vector<1x256xf32>
    %c32_i32_12 = arith.constant 32 : i32
    %58 = vector.broadcast %c32_i32_12 : i32 to vector<1x256xi32>
    %59 = arith.cmpi sge, %3, %58 : vector<1x256xi32>
    %c256_i32_13 = arith.constant 256 : i32
    %60 = vector.broadcast %c256_i32_13 : i32 to vector<1x256xi32>
    %61 = arith.cmpi slt, %3, %60 : vector<1x256xi32>
    %62 = arith.andi %59, %61 : vector<1x256xi1>
    %c0_i32_14 = arith.constant 0 : i32
    %63 = vector.broadcast %c0_i32_14 : i32 to vector<1x256xi32>
    %64 = arith.cmpi sge, %5, %63 : vector<1x256xi32>
    %65 = arith.andi %62, %64 : vector<1x256xi1>
    %c14_i32 = arith.constant 14 : i32
    %66 = vector.broadcast %c14_i32 : i32 to vector<1x256xi32>
    %67 = arith.cmpi slt, %5, %66 : vector<1x256xi32>
    %68 = arith.andi %65, %67 : vector<1x256xi1>
    %69 = arith.extui %68 : vector<1x256xi1> to vector<1x256xi32>
    %70 = arith.sitofp %69 : vector<1x256xi32> to vector<1x256xf32>
    %c16_i32_15 = arith.constant 16 : i32
    %71 = vector.broadcast %c16_i32_15 : i32 to vector<1x256xi32>
    %72 = arith.cmpi sge, %3, %71 : vector<1x256xi32>
    %c256_i32_16 = arith.constant 256 : i32
    %73 = vector.broadcast %c256_i32_16 : i32 to vector<1x256xi32>
    %74 = arith.cmpi slt, %3, %73 : vector<1x256xi32>
    %75 = arith.andi %72, %74 : vector<1x256xi1>
    %c2_i32_17 = arith.constant 2 : i32
    %76 = vector.broadcast %c2_i32_17 : i32 to vector<1x256xi32>
    %77 = arith.cmpi sge, %5, %76 : vector<1x256xi32>
    %78 = arith.andi %75, %77 : vector<1x256xi1>
    %c16_i32_18 = arith.constant 16 : i32
    %79 = vector.broadcast %c16_i32_18 : i32 to vector<1x256xi32>
    %80 = arith.cmpi slt, %5, %79 : vector<1x256xi32>
    %81 = arith.andi %78, %80 : vector<1x256xi1>
    %82 = arith.extui %81 : vector<1x256xi1> to vector<1x256xi32>
    %83 = arith.sitofp %82 : vector<1x256xi32> to vector<1x256xf32>
    %c16_i32_19 = arith.constant 16 : i32
    %84 = vector.broadcast %c16_i32_19 : i32 to vector<1x256xi32>
    %85 = arith.cmpi sge, %3, %84 : vector<1x256xi32>
    %c256_i32_20 = arith.constant 256 : i32
    %86 = vector.broadcast %c256_i32_20 : i32 to vector<1x256xi32>
    %87 = arith.cmpi slt, %3, %86 : vector<1x256xi32>
    %88 = arith.andi %85, %87 : vector<1x256xi1>
    %c1_i32_21 = arith.constant 1 : i32
    %89 = vector.broadcast %c1_i32_21 : i32 to vector<1x256xi32>
    %90 = arith.cmpi sge, %5, %89 : vector<1x256xi32>
    %91 = arith.andi %88, %90 : vector<1x256xi1>
    %c16_i32_22 = arith.constant 16 : i32
    %92 = vector.broadcast %c16_i32_22 : i32 to vector<1x256xi32>
    %93 = arith.cmpi slt, %5, %92 : vector<1x256xi32>
    %94 = arith.andi %91, %93 : vector<1x256xi1>
    %95 = arith.extui %94 : vector<1x256xi1> to vector<1x256xi32>
    %96 = arith.sitofp %95 : vector<1x256xi32> to vector<1x256xf32>
    %c16_i32_23 = arith.constant 16 : i32
    %97 = vector.broadcast %c16_i32_23 : i32 to vector<1x256xi32>
    %98 = arith.cmpi sge, %3, %97 : vector<1x256xi32>
    %c256_i32_24 = arith.constant 256 : i32
    %99 = vector.broadcast %c256_i32_24 : i32 to vector<1x256xi32>
    %100 = arith.cmpi slt, %3, %99 : vector<1x256xi32>
    %101 = arith.andi %98, %100 : vector<1x256xi1>
    %c0_i32_25 = arith.constant 0 : i32
    %102 = vector.broadcast %c0_i32_25 : i32 to vector<1x256xi32>
    %103 = arith.cmpi sge, %5, %102 : vector<1x256xi32>
    %104 = arith.andi %101, %103 : vector<1x256xi1>
    %c16_i32_26 = arith.constant 16 : i32
    %105 = vector.broadcast %c16_i32_26 : i32 to vector<1x256xi32>
    %106 = arith.cmpi slt, %5, %105 : vector<1x256xi32>
    %107 = arith.andi %104, %106 : vector<1x256xi1>
    %108 = arith.extui %107 : vector<1x256xi1> to vector<1x256xi32>
    %109 = arith.sitofp %108 : vector<1x256xi32> to vector<1x256xf32>
    %c16_i32_27 = arith.constant 16 : i32
    %110 = vector.broadcast %c16_i32_27 : i32 to vector<1x256xi32>
    %111 = arith.cmpi sge, %3, %110 : vector<1x256xi32>
    %c256_i32_28 = arith.constant 256 : i32
    %112 = vector.broadcast %c256_i32_28 : i32 to vector<1x256xi32>
    %113 = arith.cmpi slt, %3, %112 : vector<1x256xi32>
    %114 = arith.andi %111, %113 : vector<1x256xi1>
    %c0_i32_29 = arith.constant 0 : i32
    %115 = vector.broadcast %c0_i32_29 : i32 to vector<1x256xi32>
    %116 = arith.cmpi sge, %5, %115 : vector<1x256xi32>
    %117 = arith.andi %114, %116 : vector<1x256xi1>
    %c15_i32_30 = arith.constant 15 : i32
    %118 = vector.broadcast %c15_i32_30 : i32 to vector<1x256xi32>
    %119 = arith.cmpi slt, %5, %118 : vector<1x256xi32>
    %120 = arith.andi %117, %119 : vector<1x256xi1>
    %121 = arith.extui %120 : vector<1x256xi1> to vector<1x256xi32>
    %122 = arith.sitofp %121 : vector<1x256xi32> to vector<1x256xf32>
    %c16_i32_31 = arith.constant 16 : i32
    %123 = vector.broadcast %c16_i32_31 : i32 to vector<1x256xi32>
    %124 = arith.cmpi sge, %3, %123 : vector<1x256xi32>
    %c256_i32_32 = arith.constant 256 : i32
    %125 = vector.broadcast %c256_i32_32 : i32 to vector<1x256xi32>
    %126 = arith.cmpi slt, %3, %125 : vector<1x256xi32>
    %127 = arith.andi %124, %126 : vector<1x256xi1>
    %c0_i32_33 = arith.constant 0 : i32
    %128 = vector.broadcast %c0_i32_33 : i32 to vector<1x256xi32>
    %129 = arith.cmpi sge, %5, %128 : vector<1x256xi32>
    %130 = arith.andi %127, %129 : vector<1x256xi1>
    %c14_i32_34 = arith.constant 14 : i32
    %131 = vector.broadcast %c14_i32_34 : i32 to vector<1x256xi32>
    %132 = arith.cmpi slt, %5, %131 : vector<1x256xi32>
    %133 = arith.andi %130, %132 : vector<1x256xi1>
    %134 = arith.extui %133 : vector<1x256xi1> to vector<1x256xi32>
    %135 = arith.sitofp %134 : vector<1x256xi32> to vector<1x256xf32>
    %c0_i32_35 = arith.constant 0 : i32
    %136 = vector.broadcast %c0_i32_35 : i32 to vector<1x256xi32>
    %137 = arith.cmpi sge, %3, %136 : vector<1x256xi32>
    %c256_i32_36 = arith.constant 256 : i32
    %138 = vector.broadcast %c256_i32_36 : i32 to vector<1x256xi32>
    %139 = arith.cmpi slt, %3, %138 : vector<1x256xi32>
    %140 = arith.andi %137, %139 : vector<1x256xi1>
    %c2_i32_37 = arith.constant 2 : i32
    %141 = vector.broadcast %c2_i32_37 : i32 to vector<1x256xi32>
    %142 = arith.cmpi sge, %5, %141 : vector<1x256xi32>
    %143 = arith.andi %140, %142 : vector<1x256xi1>
    %c16_i32_38 = arith.constant 16 : i32
    %144 = vector.broadcast %c16_i32_38 : i32 to vector<1x256xi32>
    %145 = arith.cmpi slt, %5, %144 : vector<1x256xi32>
    %146 = arith.andi %143, %145 : vector<1x256xi1>
    %147 = arith.extui %146 : vector<1x256xi1> to vector<1x256xi32>
    %148 = arith.sitofp %147 : vector<1x256xi32> to vector<1x256xf32>
    %c0_i32_39 = arith.constant 0 : i32
    %149 = vector.broadcast %c0_i32_39 : i32 to vector<1x256xi32>
    %150 = arith.cmpi sge, %3, %149 : vector<1x256xi32>
    %c256_i32_40 = arith.constant 256 : i32
    %151 = vector.broadcast %c256_i32_40 : i32 to vector<1x256xi32>
    %152 = arith.cmpi slt, %3, %151 : vector<1x256xi32>
    %153 = arith.andi %150, %152 : vector<1x256xi1>
    %c1_i32_41 = arith.constant 1 : i32
    %154 = vector.broadcast %c1_i32_41 : i32 to vector<1x256xi32>
    %155 = arith.cmpi sge, %5, %154 : vector<1x256xi32>
    %156 = arith.andi %153, %155 : vector<1x256xi1>
    %c16_i32_42 = arith.constant 16 : i32
    %157 = vector.broadcast %c16_i32_42 : i32 to vector<1x256xi32>
    %158 = arith.cmpi slt, %5, %157 : vector<1x256xi32>
    %159 = arith.andi %156, %158 : vector<1x256xi1>
    %160 = arith.extui %159 : vector<1x256xi1> to vector<1x256xi32>
    %161 = arith.sitofp %160 : vector<1x256xi32> to vector<1x256xf32>
    %c0_i32_43 = arith.constant 0 : i32
    %162 = vector.broadcast %c0_i32_43 : i32 to vector<1x256xi32>
    %163 = arith.cmpi sge, %3, %162 : vector<1x256xi32>
    %c256_i32_44 = arith.constant 256 : i32
    %164 = vector.broadcast %c256_i32_44 : i32 to vector<1x256xi32>
    %165 = arith.cmpi slt, %3, %164 : vector<1x256xi32>
    %166 = arith.andi %163, %165 : vector<1x256xi1>
    %c0_i32_45 = arith.constant 0 : i32
    %167 = vector.broadcast %c0_i32_45 : i32 to vector<1x256xi32>
    %168 = arith.cmpi sge, %5, %167 : vector<1x256xi32>
    %169 = arith.andi %166, %168 : vector<1x256xi1>
    %c16_i32_46 = arith.constant 16 : i32
    %170 = vector.broadcast %c16_i32_46 : i32 to vector<1x256xi32>
    %171 = arith.cmpi slt, %5, %170 : vector<1x256xi32>
    %172 = arith.andi %169, %171 : vector<1x256xi1>
    %173 = arith.extui %172 : vector<1x256xi1> to vector<1x256xi32>
    %174 = arith.sitofp %173 : vector<1x256xi32> to vector<1x256xf32>
    %c0_i32_47 = arith.constant 0 : i32
    %175 = vector.broadcast %c0_i32_47 : i32 to vector<1x256xi32>
    %176 = arith.cmpi sge, %3, %175 : vector<1x256xi32>
    %c256_i32_48 = arith.constant 256 : i32
    %177 = vector.broadcast %c256_i32_48 : i32 to vector<1x256xi32>
    %178 = arith.cmpi slt, %3, %177 : vector<1x256xi32>
    %179 = arith.andi %176, %178 : vector<1x256xi1>
    %c0_i32_49 = arith.constant 0 : i32
    %180 = vector.broadcast %c0_i32_49 : i32 to vector<1x256xi32>
    %181 = arith.cmpi sge, %5, %180 : vector<1x256xi32>
    %182 = arith.andi %179, %181 : vector<1x256xi1>
    %c15_i32_50 = arith.constant 15 : i32
    %183 = vector.broadcast %c15_i32_50 : i32 to vector<1x256xi32>
    %184 = arith.cmpi slt, %5, %183 : vector<1x256xi32>
    %185 = arith.andi %182, %184 : vector<1x256xi1>
    %186 = arith.extui %185 : vector<1x256xi1> to vector<1x256xi32>
    %187 = arith.sitofp %186 : vector<1x256xi32> to vector<1x256xf32>
    %c0_i32_51 = arith.constant 0 : i32
    %188 = vector.broadcast %c0_i32_51 : i32 to vector<1x256xi32>
    %189 = arith.cmpi sge, %3, %188 : vector<1x256xi32>
    %c256_i32_52 = arith.constant 256 : i32
    %190 = vector.broadcast %c256_i32_52 : i32 to vector<1x256xi32>
    %191 = arith.cmpi slt, %3, %190 : vector<1x256xi32>
    %192 = arith.andi %189, %191 : vector<1x256xi1>
    %c0_i32_53 = arith.constant 0 : i32
    %193 = vector.broadcast %c0_i32_53 : i32 to vector<1x256xi32>
    %194 = arith.cmpi sge, %5, %193 : vector<1x256xi32>
    %195 = arith.andi %192, %194 : vector<1x256xi1>
    %c14_i32_54 = arith.constant 14 : i32
    %196 = vector.broadcast %c14_i32_54 : i32 to vector<1x256xi32>
    %197 = arith.cmpi slt, %5, %196 : vector<1x256xi32>
    %198 = arith.andi %195, %197 : vector<1x256xi1>
    %199 = arith.extui %198 : vector<1x256xi1> to vector<1x256xi32>
    %200 = arith.sitofp %199 : vector<1x256xi32> to vector<1x256xf32>
    %c0_i32_55 = arith.constant 0 : i32
    %201 = vector.broadcast %c0_i32_55 : i32 to vector<1x256xi32>
    %202 = arith.cmpi sge, %3, %201 : vector<1x256xi32>
    %c240_i32 = arith.constant 240 : i32
    %203 = vector.broadcast %c240_i32 : i32 to vector<1x256xi32>
    %204 = arith.cmpi slt, %3, %203 : vector<1x256xi32>
    %205 = arith.andi %202, %204 : vector<1x256xi1>
    %c2_i32_56 = arith.constant 2 : i32
    %206 = vector.broadcast %c2_i32_56 : i32 to vector<1x256xi32>
    %207 = arith.cmpi sge, %5, %206 : vector<1x256xi32>
    %208 = arith.andi %205, %207 : vector<1x256xi1>
    %c16_i32_57 = arith.constant 16 : i32
    %209 = vector.broadcast %c16_i32_57 : i32 to vector<1x256xi32>
    %210 = arith.cmpi slt, %5, %209 : vector<1x256xi32>
    %211 = arith.andi %208, %210 : vector<1x256xi1>
    %212 = arith.extui %211 : vector<1x256xi1> to vector<1x256xi32>
    %213 = arith.sitofp %212 : vector<1x256xi32> to vector<1x256xf32>
    %c0_i32_58 = arith.constant 0 : i32
    %214 = vector.broadcast %c0_i32_58 : i32 to vector<1x256xi32>
    %215 = arith.cmpi sge, %3, %214 : vector<1x256xi32>
    %c240_i32_59 = arith.constant 240 : i32
    %216 = vector.broadcast %c240_i32_59 : i32 to vector<1x256xi32>
    %217 = arith.cmpi slt, %3, %216 : vector<1x256xi32>
    %218 = arith.andi %215, %217 : vector<1x256xi1>
    %c1_i32_60 = arith.constant 1 : i32
    %219 = vector.broadcast %c1_i32_60 : i32 to vector<1x256xi32>
    %220 = arith.cmpi sge, %5, %219 : vector<1x256xi32>
    %221 = arith.andi %218, %220 : vector<1x256xi1>
    %c16_i32_61 = arith.constant 16 : i32
    %222 = vector.broadcast %c16_i32_61 : i32 to vector<1x256xi32>
    %223 = arith.cmpi slt, %5, %222 : vector<1x256xi32>
    %224 = arith.andi %221, %223 : vector<1x256xi1>
    %225 = arith.extui %224 : vector<1x256xi1> to vector<1x256xi32>
    %226 = arith.sitofp %225 : vector<1x256xi32> to vector<1x256xf32>
    %c0_i32_62 = arith.constant 0 : i32
    %227 = vector.broadcast %c0_i32_62 : i32 to vector<1x256xi32>
    %228 = arith.cmpi sge, %3, %227 : vector<1x256xi32>
    %c240_i32_63 = arith.constant 240 : i32
    %229 = vector.broadcast %c240_i32_63 : i32 to vector<1x256xi32>
    %230 = arith.cmpi slt, %3, %229 : vector<1x256xi32>
    %231 = arith.andi %228, %230 : vector<1x256xi1>
    %c0_i32_64 = arith.constant 0 : i32
    %232 = vector.broadcast %c0_i32_64 : i32 to vector<1x256xi32>
    %233 = arith.cmpi sge, %5, %232 : vector<1x256xi32>
    %234 = arith.andi %231, %233 : vector<1x256xi1>
    %c16_i32_65 = arith.constant 16 : i32
    %235 = vector.broadcast %c16_i32_65 : i32 to vector<1x256xi32>
    %236 = arith.cmpi slt, %5, %235 : vector<1x256xi32>
    %237 = arith.andi %234, %236 : vector<1x256xi1>
    %238 = arith.extui %237 : vector<1x256xi1> to vector<1x256xi32>
    %239 = arith.sitofp %238 : vector<1x256xi32> to vector<1x256xf32>
    %c0_i32_66 = arith.constant 0 : i32
    %240 = vector.broadcast %c0_i32_66 : i32 to vector<1x256xi32>
    %241 = arith.cmpi sge, %3, %240 : vector<1x256xi32>
    %c240_i32_67 = arith.constant 240 : i32
    %242 = vector.broadcast %c240_i32_67 : i32 to vector<1x256xi32>
    %243 = arith.cmpi slt, %3, %242 : vector<1x256xi32>
    %244 = arith.andi %241, %243 : vector<1x256xi1>
    %c0_i32_68 = arith.constant 0 : i32
    %245 = vector.broadcast %c0_i32_68 : i32 to vector<1x256xi32>
    %246 = arith.cmpi sge, %5, %245 : vector<1x256xi32>
    %247 = arith.andi %244, %246 : vector<1x256xi1>
    %c15_i32_69 = arith.constant 15 : i32
    %248 = vector.broadcast %c15_i32_69 : i32 to vector<1x256xi32>
    %249 = arith.cmpi slt, %5, %248 : vector<1x256xi32>
    %250 = arith.andi %247, %249 : vector<1x256xi1>
    %251 = arith.extui %250 : vector<1x256xi1> to vector<1x256xi32>
    %252 = arith.sitofp %251 : vector<1x256xi32> to vector<1x256xf32>
    %c0_i32_70 = arith.constant 0 : i32
    %253 = vector.broadcast %c0_i32_70 : i32 to vector<1x256xi32>
    %254 = arith.cmpi sge, %3, %253 : vector<1x256xi32>
    %c240_i32_71 = arith.constant 240 : i32
    %255 = vector.broadcast %c240_i32_71 : i32 to vector<1x256xi32>
    %256 = arith.cmpi slt, %3, %255 : vector<1x256xi32>
    %257 = arith.andi %254, %256 : vector<1x256xi1>
    %c0_i32_72 = arith.constant 0 : i32
    %258 = vector.broadcast %c0_i32_72 : i32 to vector<1x256xi32>
    %259 = arith.cmpi sge, %5, %258 : vector<1x256xi32>
    %260 = arith.andi %257, %259 : vector<1x256xi1>
    %c14_i32_73 = arith.constant 14 : i32
    %261 = vector.broadcast %c14_i32_73 : i32 to vector<1x256xi32>
    %262 = arith.cmpi slt, %5, %261 : vector<1x256xi32>
    %263 = arith.andi %260, %262 : vector<1x256xi1>
    %264 = arith.extui %263 : vector<1x256xi1> to vector<1x256xi32>
    %265 = arith.sitofp %264 : vector<1x256xi32> to vector<1x256xf32>
    %c0_i32_74 = arith.constant 0 : i32
    %266 = vector.broadcast %c0_i32_74 : i32 to vector<1x256xi32>
    %267 = arith.cmpi sge, %3, %266 : vector<1x256xi32>
    %c224_i32 = arith.constant 224 : i32
    %268 = vector.broadcast %c224_i32 : i32 to vector<1x256xi32>
    %269 = arith.cmpi slt, %3, %268 : vector<1x256xi32>
    %270 = arith.andi %267, %269 : vector<1x256xi1>
    %c2_i32_75 = arith.constant 2 : i32
    %271 = vector.broadcast %c2_i32_75 : i32 to vector<1x256xi32>
    %272 = arith.cmpi sge, %5, %271 : vector<1x256xi32>
    %273 = arith.andi %270, %272 : vector<1x256xi1>
    %c16_i32_76 = arith.constant 16 : i32
    %274 = vector.broadcast %c16_i32_76 : i32 to vector<1x256xi32>
    %275 = arith.cmpi slt, %5, %274 : vector<1x256xi32>
    %276 = arith.andi %273, %275 : vector<1x256xi1>
    %277 = arith.extui %276 : vector<1x256xi1> to vector<1x256xi32>
    %278 = arith.sitofp %277 : vector<1x256xi32> to vector<1x256xf32>
    %c0_i32_77 = arith.constant 0 : i32
    %279 = vector.broadcast %c0_i32_77 : i32 to vector<1x256xi32>
    %280 = arith.cmpi sge, %3, %279 : vector<1x256xi32>
    %c224_i32_78 = arith.constant 224 : i32
    %281 = vector.broadcast %c224_i32_78 : i32 to vector<1x256xi32>
    %282 = arith.cmpi slt, %3, %281 : vector<1x256xi32>
    %283 = arith.andi %280, %282 : vector<1x256xi1>
    %c1_i32_79 = arith.constant 1 : i32
    %284 = vector.broadcast %c1_i32_79 : i32 to vector<1x256xi32>
    %285 = arith.cmpi sge, %5, %284 : vector<1x256xi32>
    %286 = arith.andi %283, %285 : vector<1x256xi1>
    %c16_i32_80 = arith.constant 16 : i32
    %287 = vector.broadcast %c16_i32_80 : i32 to vector<1x256xi32>
    %288 = arith.cmpi slt, %5, %287 : vector<1x256xi32>
    %289 = arith.andi %286, %288 : vector<1x256xi1>
    %290 = arith.extui %289 : vector<1x256xi1> to vector<1x256xi32>
    %291 = arith.sitofp %290 : vector<1x256xi32> to vector<1x256xf32>
    %c0_i32_81 = arith.constant 0 : i32
    %292 = vector.broadcast %c0_i32_81 : i32 to vector<1x256xi32>
    %293 = arith.cmpi sge, %3, %292 : vector<1x256xi32>
    %c224_i32_82 = arith.constant 224 : i32
    %294 = vector.broadcast %c224_i32_82 : i32 to vector<1x256xi32>
    %295 = arith.cmpi slt, %3, %294 : vector<1x256xi32>
    %296 = arith.andi %293, %295 : vector<1x256xi1>
    %c0_i32_83 = arith.constant 0 : i32
    %297 = vector.broadcast %c0_i32_83 : i32 to vector<1x256xi32>
    %298 = arith.cmpi sge, %5, %297 : vector<1x256xi32>
    %299 = arith.andi %296, %298 : vector<1x256xi1>
    %c16_i32_84 = arith.constant 16 : i32
    %300 = vector.broadcast %c16_i32_84 : i32 to vector<1x256xi32>
    %301 = arith.cmpi slt, %5, %300 : vector<1x256xi32>
    %302 = arith.andi %299, %301 : vector<1x256xi1>
    %303 = arith.extui %302 : vector<1x256xi1> to vector<1x256xi32>
    %304 = arith.sitofp %303 : vector<1x256xi32> to vector<1x256xf32>
    %c0_i32_85 = arith.constant 0 : i32
    %305 = vector.broadcast %c0_i32_85 : i32 to vector<1x256xi32>
    %306 = arith.cmpi sge, %3, %305 : vector<1x256xi32>
    %c224_i32_86 = arith.constant 224 : i32
    %307 = vector.broadcast %c224_i32_86 : i32 to vector<1x256xi32>
    %308 = arith.cmpi slt, %3, %307 : vector<1x256xi32>
    %309 = arith.andi %306, %308 : vector<1x256xi1>
    %c0_i32_87 = arith.constant 0 : i32
    %310 = vector.broadcast %c0_i32_87 : i32 to vector<1x256xi32>
    %311 = arith.cmpi sge, %5, %310 : vector<1x256xi32>
    %312 = arith.andi %309, %311 : vector<1x256xi1>
    %c15_i32_88 = arith.constant 15 : i32
    %313 = vector.broadcast %c15_i32_88 : i32 to vector<1x256xi32>
    %314 = arith.cmpi slt, %5, %313 : vector<1x256xi32>
    %315 = arith.andi %312, %314 : vector<1x256xi1>
    %316 = arith.extui %315 : vector<1x256xi1> to vector<1x256xi32>
    %317 = arith.sitofp %316 : vector<1x256xi32> to vector<1x256xf32>
    %c0_i32_89 = arith.constant 0 : i32
    %318 = vector.broadcast %c0_i32_89 : i32 to vector<1x256xi32>
    %319 = arith.cmpi sge, %3, %318 : vector<1x256xi32>
    %c224_i32_90 = arith.constant 224 : i32
    %320 = vector.broadcast %c224_i32_90 : i32 to vector<1x256xi32>
    %321 = arith.cmpi slt, %3, %320 : vector<1x256xi32>
    %322 = arith.andi %319, %321 : vector<1x256xi1>
    %c0_i32_91 = arith.constant 0 : i32
    %323 = vector.broadcast %c0_i32_91 : i32 to vector<1x256xi32>
    %324 = arith.cmpi sge, %5, %323 : vector<1x256xi32>
    %325 = arith.andi %322, %324 : vector<1x256xi1>
    %c14_i32_92 = arith.constant 14 : i32
    %326 = vector.broadcast %c14_i32_92 : i32 to vector<1x256xi32>
    %327 = arith.cmpi slt, %5, %326 : vector<1x256xi32>
    %328 = arith.andi %325, %327 : vector<1x256xi1>
    %329 = arith.extui %328 : vector<1x256xi1> to vector<1x256xi32>
    %330 = arith.sitofp %329 : vector<1x256xi32> to vector<1x256xf32>
    %c0 = arith.constant 0 : index
    %c0_93 = arith.constant 0 : index
    %331 = vector.load %arg2[%c0, %c0_93] : memref<8x256xf32, #tpu.memory_space<vmem>>, vector<8x256xf32>
    %c0_94 = arith.constant 0 : index
    %c0_95 = arith.constant 0 : index
    %332 = vector.load %arg3[%c0_94, %c0_95] : memref<8x1xf32, #tpu.memory_space<vmem>>, vector<8x1xf32>
    %c0_96 = arith.constant 0 : index
    %c0_97 = arith.constant 0 : index
    %c0_98 = arith.constant 0 : index
    %333 = vector.load %arg1[%c0_96, %c0_97, %c0_98] : memref<1x8x256xf32, #tpu.memory_space<vmem>>, vector<1x8x256xf32>
    %334 = vector.shape_cast %333 : vector<1x8x256xf32> to vector<8x256xf32>
    %c34_i32 = arith.constant 34 : i32
    %335 = tpu.dynamic_rotate %334 by %c34_i32 dim 1 : vector<8x256xf32>, i32 -> vector<8x256xf32>
    %336 = vector.broadcast %18 : vector<1x256xf32> to vector<8x256xf32>
    %337 = arith.mulf %335, %336 : vector<8x256xf32>
    %c0_99 = arith.constant 0 : index
    %c0_100 = arith.constant 0 : index
    %338 = vector.load %arg5[%c0_99, %c0_100] : memref<256x256xf32, #tpu.memory_space<vmem>>, vector<8x256xf32>
    tpu.vector_store %arg5[%c0_99, %c0_100], %337 {strides = array<i32>} : memref<256x256xf32, #tpu.memory_space<vmem>>, vector<8x256xf32>,
    %c33_i32 = arith.constant 33 : i32
    %339 = tpu.dynamic_rotate %334 by %c33_i32 dim 1 : vector<8x256xf32>, i32 -> vector<8x256xf32>
    %340 = vector.broadcast %31 : vector<1x256xf32> to vector<8x256xf32>
    %341 = arith.mulf %339, %340 : vector<8x256xf32>
    %c8 = arith.constant 8 : index
    %c0_101 = arith.constant 0 : index
    %342 = vector.load %arg5[%c8, %c0_101] : memref<256x256xf32, #tpu.memory_space<vmem>>, vector<8x256xf32>
    tpu.vector_store %arg5[%c8, %c0_101], %341 {strides = array<i32>} : memref<256x256xf32, #tpu.memory_space<vmem>>, vector<8x256xf32>,
    %c32_i32_102 = arith.constant 32 : i32
    %343 = tpu.dynamic_rotate %334 by %c32_i32_102 dim 1 : vector<8x256xf32>, i32 -> vector<8x256xf32>
    %344 = vector.broadcast %44 : vector<1x256xf32> to vector<8x256xf32>
    %345 = arith.mulf %343, %344 : vector<8x256xf32>
    %c16 = arith.constant 16 : index
    %c0_103 = arith.constant 0 : index
    %346 = vector.load %arg5[%c16, %c0_103] : memref<256x256xf32, #tpu.memory_space<vmem>>, vector<8x256xf32>
    tpu.vector_store %arg5[%c16, %c0_103], %345 {strides = array<i32>} : memref<256x256xf32, #tpu.memory_space<vmem>>, vector<8x256xf32>,
    %c31_i32 = arith.constant 31 : i32
    %347 = tpu.dynamic_rotate %334 by %c31_i32 dim 1 : vector<8x256xf32>, i32 -> vector<8x256xf32>
    %348 = vector.broadcast %57 : vector<1x256xf32> to vector<8x256xf32>
    %349 = arith.mulf %347, %348 : vector<8x256xf32>
    %c24 = arith.constant 24 : index
    %c0_104 = arith.constant 0 : index
    %350 = vector.load %arg5[%c24, %c0_104] : memref<256x256xf32, #tpu.memory_space<vmem>>, vector<8x256xf32>
    tpu.vector_store %arg5[%c24, %c0_104], %349 {strides = array<i32>} : memref<256x256xf32, #tpu.memory_space<vmem>>, vector<8x256xf32>,
    %c30_i32 = arith.constant 30 : i32
    %351 = tpu.dynamic_rotate %334 by %c30_i32 dim 1 : vector<8x256xf32>, i32 -> vector<8x256xf32>
    %352 = vector.broadcast %70 : vector<1x256xf32> to vector<8x256xf32>
    %353 = arith.mulf %351, %352 : vector<8x256xf32>
    %c32 = arith.constant 32 : index
    %c0_105 = arith.constant 0 : index
    %354 = vector.load %arg5[%c32, %c0_105] : memref<256x256xf32, #tpu.memory_space<vmem>>, vector<8x256xf32>
    tpu.vector_store %arg5[%c32, %c0_105], %353 {strides = array<i32>} : memref<256x256xf32, #tpu.memory_space<vmem>>, vector<8x256xf32>,
    %c18_i32 = arith.constant 18 : i32
    %355 = tpu.dynamic_rotate %334 by %c18_i32 dim 1 : vector<8x256xf32>, i32 -> vector<8x256xf32>
    %356 = vector.broadcast %83 : vector<1x256xf32> to vector<8x256xf32>
    %357 = arith.mulf %355, %356 : vector<8x256xf32>
    %c40 = arith.constant 40 : index
    %c0_106 = arith.constant 0 : index
    %358 = vector.load %arg5[%c40, %c0_106] : memref<256x256xf32, #tpu.memory_space<vmem>>, vector<8x256xf32>
    tpu.vector_store %arg5[%c40, %c0_106], %357 {strides = array<i32>} : memref<256x256xf32, #tpu.memory_space<vmem>>, vector<8x256xf32>,
    %c17_i32 = arith.constant 17 : i32
    %359 = tpu.dynamic_rotate %334 by %c17_i32 dim 1 : vector<8x256xf32>, i32 -> vector<8x256xf32>
    %360 = vector.broadcast %96 : vector<1x256xf32> to vector<8x256xf32>
    %361 = arith.mulf %359, %360 : vector<8x256xf32>
    %c48 = arith.constant 48 : index
    %c0_107 = arith.constant 0 : index
    %362 = vector.load %arg5[%c48, %c0_107] : memref<256x256xf32, #tpu.memory_space<vmem>>, vector<8x256xf32>
    tpu.vector_store %arg5[%c48, %c0_107], %361 {strides = array<i32>} : memref<256x256xf32, #tpu.memory_space<vmem>>, vector<8x256xf32>,
    %c16_i32_108 = arith.constant 16 : i32
    %363 = tpu.dynamic_rotate %334 by %c16_i32_108 dim 1 : vector<8x256xf32>, i32 -> vector<8x256xf32>
    %364 = vector.broadcast %109 : vector<1x256xf32> to vector<8x256xf32>
    %365 = arith.mulf %363, %364 : vector<8x256xf32>
    %c56 = arith.constant 56 : index
    %c0_109 = arith.constant 0 : index
    %366 = vector.load %arg5[%c56, %c0_109] : memref<256x256xf32, #tpu.memory_space<vmem>>, vector<8x256xf32>
    tpu.vector_store %arg5[%c56, %c0_109], %365 {strides = array<i32>} : memref<256x256xf32, #tpu.memory_space<vmem>>, vector<8x256xf32>,
    %c15_i32_110 = arith.constant 15 : i32
    %367 = tpu.dynamic_rotate %334 by %c15_i32_110 dim 1 : vector<8x256xf32>, i32 -> vector<8x256xf32>
    %368 = vector.broadcast %122 : vector<1x256xf32> to vector<8x256xf32>
    %369 = arith.mulf %367, %368 : vector<8x256xf32>
    %c64 = arith.constant 64 : index
    %c0_111 = arith.constant 0 : index
    %370 = vector.load %arg5[%c64, %c0_111] : memref<256x256xf32, #tpu.memory_space<vmem>>, vector<8x256xf32>
    tpu.vector_store %arg5[%c64, %c0_111], %369 {strides = array<i32>} : memref<256x256xf32, #tpu.memory_space<vmem>>, vector<8x256xf32>,
    %c14_i32_112 = arith.constant 14 : i32
    %371 = tpu.dynamic_rotate %334 by %c14_i32_112 dim 1 : vector<8x256xf32>, i32 -> vector<8x256xf32>
    %372 = vector.broadcast %135 : vector<1x256xf32> to vector<8x256xf32>
    %373 = arith.mulf %371, %372 : vector<8x256xf32>
    %c72 = arith.constant 72 : index
    %c0_113 = arith.constant 0 : index
    %374 = vector.load %arg5[%c72, %c0_113] : memref<256x256xf32, #tpu.memory_space<vmem>>, vector<8x256xf32>
    tpu.vector_store %arg5[%c72, %c0_113], %373 {strides = array<i32>} : memref<256x256xf32, #tpu.memory_space<vmem>>, vector<8x256xf32>,
    %c2_i32_114 = arith.constant 2 : i32
    %375 = tpu.dynamic_rotate %334 by %c2_i32_114 dim 1 : vector<8x256xf32>, i32 -> vector<8x256xf32>
    %376 = vector.broadcast %148 : vector<1x256xf32> to vector<8x256xf32>
    %377 = arith.mulf %375, %376 : vector<8x256xf32>
    %c80 = arith.constant 80 : index
    %c0_115 = arith.constant 0 : index
    %378 = vector.load %arg5[%c80, %c0_115] : memref<256x256xf32, #tpu.memory_space<vmem>>, vector<8x256xf32>
    tpu.vector_store %arg5[%c80, %c0_115], %377 {strides = array<i32>} : memref<256x256xf32, #tpu.memory_space<vmem>>, vector<8x256xf32>,
    %c1_i32_116 = arith.constant 1 : i32
    %379 = tpu.dynamic_rotate %334 by %c1_i32_116 dim 1 : vector<8x256xf32>, i32 -> vector<8x256xf32>
    %380 = vector.broadcast %161 : vector<1x256xf32> to vector<8x256xf32>
    %381 = arith.mulf %379, %380 : vector<8x256xf32>
    %c88 = arith.constant 88 : index
    %c0_117 = arith.constant 0 : index
    %382 = vector.load %arg5[%c88, %c0_117] : memref<256x256xf32, #tpu.memory_space<vmem>>, vector<8x256xf32>
    tpu.vector_store %arg5[%c88, %c0_117], %381 {strides = array<i32>} : memref<256x256xf32, #tpu.memory_space<vmem>>, vector<8x256xf32>,
    %383 = vector.broadcast %174 : vector<1x256xf32> to vector<8x256xf32>
    %384 = arith.mulf %334, %383 : vector<8x256xf32>
    %c96 = arith.constant 96 : index
    %c0_118 = arith.constant 0 : index
    %385 = vector.load %arg5[%c96, %c0_118] : memref<256x256xf32, #tpu.memory_space<vmem>>, vector<8x256xf32>
    tpu.vector_store %arg5[%c96, %c0_118], %384 {strides = array<i32>} : memref<256x256xf32, #tpu.memory_space<vmem>>, vector<8x256xf32>,
    %c255_i32 = arith.constant 255 : i32
    %386 = tpu.dynamic_rotate %334 by %c255_i32 dim 1 : vector<8x256xf32>, i32 -> vector<8x256xf32>
    %387 = vector.broadcast %187 : vector<1x256xf32> to vector<8x256xf32>
    %388 = arith.mulf %386, %387 : vector<8x256xf32>
    %c104 = arith.constant 104 : index
    %c0_119 = arith.constant 0 : index
    %389 = vector.load %arg5[%c104, %c0_119] : memref<256x256xf32, #tpu.memory_space<vmem>>, vector<8x256xf32>
    tpu.vector_store %arg5[%c104, %c0_119], %388 {strides = array<i32>} : memref<256x256xf32, #tpu.memory_space<vmem>>, vector<8x256xf32>,
    %c254_i32 = arith.constant 254 : i32
    %390 = tpu.dynamic_rotate %334 by %c254_i32 dim 1 : vector<8x256xf32>, i32 -> vector<8x256xf32>
    %391 = vector.broadcast %200 : vector<1x256xf32> to vector<8x256xf32>
    %392 = arith.mulf %390, %391 : vector<8x256xf32>
    %c112 = arith.constant 112 : index
    %c0_120 = arith.constant 0 : index
    %393 = vector.load %arg5[%c112, %c0_120] : memref<256x256xf32, #tpu.memory_space<vmem>>, vector<8x256xf32>
    tpu.vector_store %arg5[%c112, %c0_120], %392 {strides = array<i32>} : memref<256x256xf32, #tpu.memory_space<vmem>>, vector<8x256xf32>,
    %c242_i32 = arith.constant 242 : i32
    %394 = tpu.dynamic_rotate %334 by %c242_i32 dim 1 : vector<8x256xf32>, i32 -> vector<8x256xf32>
    %395 = vector.broadcast %213 : vector<1x256xf32> to vector<8x256xf32>
    %396 = arith.mulf %394, %395 : vector<8x256xf32>
    %c120 = arith.constant 120 : index
    %c0_121 = arith.constant 0 : index
    %397 = vector.load %arg5[%c120, %c0_121] : memref<256x256xf32, #tpu.memory_space<vmem>>, vector<8x256xf32>
    tpu.vector_store %arg5[%c120, %c0_121], %396 {strides = array<i32>} : memref<256x256xf32, #tpu.memory_space<vmem>>, vector<8x256xf32>,
    %c241_i32 = arith.constant 241 : i32
    %398 = tpu.dynamic_rotate %334 by %c241_i32 dim 1 : vector<8x256xf32>, i32 -> vector<8x256xf32>
    %399 = vector.broadcast %226 : vector<1x256xf32> to vector<8x256xf32>
    %400 = arith.mulf %398, %399 : vector<8x256xf32>
    %c128 = arith.constant 128 : index
    %c0_122 = arith.constant 0 : index
    %401 = vector.load %arg5[%c128, %c0_122] : memref<256x256xf32, #tpu.memory_space<vmem>>, vector<8x256xf32>
    tpu.vector_store %arg5[%c128, %c0_122], %400 {strides = array<i32>} : memref<256x256xf32, #tpu.memory_space<vmem>>, vector<8x256xf32>,
    %c240_i32_123 = arith.constant 240 : i32
    %402 = tpu.dynamic_rotate %334 by %c240_i32_123 dim 1 : vector<8x256xf32>, i32 -> vector<8x256xf32>
    %403 = vector.broadcast %239 : vector<1x256xf32> to vector<8x256xf32>
    %404 = arith.mulf %402, %403 : vector<8x256xf32>
    %c136 = arith.constant 136 : index
    %c0_124 = arith.constant 0 : index
    %405 = vector.load %arg5[%c136, %c0_124] : memref<256x256xf32, #tpu.memory_space<vmem>>, vector<8x256xf32>
    tpu.vector_store %arg5[%c136, %c0_124], %404 {strides = array<i32>} : memref<256x256xf32, #tpu.memory_space<vmem>>, vector<8x256xf32>,
    %c239_i32 = arith.constant 239 : i32
    %406 = tpu.dynamic_rotate %334 by %c239_i32 dim 1 : vector<8x256xf32>, i32 -> vector<8x256xf32>
    %407 = vector.broadcast %252 : vector<1x256xf32> to vector<8x256xf32>
    %408 = arith.mulf %406, %407 : vector<8x256xf32>
    %c144 = arith.constant 144 : index
    %c0_125 = arith.constant 0 : index
    %409 = vector.load %arg5[%c144, %c0_125] : memref<256x256xf32, #tpu.memory_space<vmem>>, vector<8x256xf32>
    tpu.vector_store %arg5[%c144, %c0_125], %408 {strides = array<i32>} : memref<256x256xf32, #tpu.memory_space<vmem>>, vector<8x256xf32>,
    %c238_i32 = arith.constant 238 : i32
    %410 = tpu.dynamic_rotate %334 by %c238_i32 dim 1 : vector<8x256xf32>, i32 -> vector<8x256xf32>
    %411 = vector.broadcast %265 : vector<1x256xf32> to vector<8x256xf32>
    %412 = arith.mulf %410, %411 : vector<8x256xf32>
    %c152 = arith.constant 152 : index
    %c0_126 = arith.constant 0 : index
    %413 = vector.load %arg5[%c152, %c0_126] : memref<256x256xf32, #tpu.memory_space<vmem>>, vector<8x256xf32>
    tpu.vector_store %arg5[%c152, %c0_126], %412 {strides = array<i32>} : memref<256x256xf32, #tpu.memory_space<vmem>>, vector<8x256xf32>,
    %c226_i32 = arith.constant 226 : i32
    %414 = tpu.dynamic_rotate %334 by %c226_i32 dim 1 : vector<8x256xf32>, i32 -> vector<8x256xf32>
    %415 = vector.broadcast %278 : vector<1x256xf32> to vector<8x256xf32>
    %416 = arith.mulf %414, %415 : vector<8x256xf32>
    %c160 = arith.constant 160 : index
    %c0_127 = arith.constant 0 : index
    %417 = vector.load %arg5[%c160, %c0_127] : memref<256x256xf32, #tpu.memory_space<vmem>>, vector<8x256xf32>
    tpu.vector_store %arg5[%c160, %c0_127], %416 {strides = array<i32>} : memref<256x256xf32, #tpu.memory_space<vmem>>, vector<8x256xf32>,
    %c225_i32 = arith.constant 225 : i32
    %418 = tpu.dynamic_rotate %334 by %c225_i32 dim 1 : vector<8x256xf32>, i32 -> vector<8x256xf32>
    %419 = vector.broadcast %291 : vector<1x256xf32> to vector<8x256xf32>
    %420 = arith.mulf %418, %419 : vector<8x256xf32>
    %c168 = arith.constant 168 : index
    %c0_128 = arith.constant 0 : index
    %421 = vector.load %arg5[%c168, %c0_128] : memref<256x256xf32, #tpu.memory_space<vmem>>, vector<8x256xf32>
    tpu.vector_store %arg5[%c168, %c0_128], %420 {strides = array<i32>} : memref<256x256xf32, #tpu.memory_space<vmem>>, vector<8x256xf32>,
    %c224_i32_129 = arith.constant 224 : i32
    %422 = tpu.dynamic_rotate %334 by %c224_i32_129 dim 1 : vector<8x256xf32>, i32 -> vector<8x256xf32>
    %423 = vector.broadcast %304 : vector<1x256xf32> to vector<8x256xf32>
    %424 = arith.mulf %422, %423 : vector<8x256xf32>
    %c176 = arith.constant 176 : index
    %c0_130 = arith.constant 0 : index
    %425 = vector.load %arg5[%c176, %c0_130] : memref<256x256xf32, #tpu.memory_space<vmem>>, vector<8x256xf32>
    tpu.vector_store %arg5[%c176, %c0_130], %424 {strides = array<i32>} : memref<256x256xf32, #tpu.memory_space<vmem>>, vector<8x256xf32>,
    %c223_i32 = arith.constant 223 : i32
    %426 = tpu.dynamic_rotate %334 by %c223_i32 dim 1 : vector<8x256xf32>, i32 -> vector<8x256xf32>
    %427 = vector.broadcast %317 : vector<1x256xf32> to vector<8x256xf32>
    %428 = arith.mulf %426, %427 : vector<8x256xf32>
    %c184 = arith.constant 184 : index
    %c0_131 = arith.constant 0 : index
    %429 = vector.load %arg5[%c184, %c0_131] : memref<256x256xf32, #tpu.memory_space<vmem>>, vector<8x256xf32>
    tpu.vector_store %arg5[%c184, %c0_131], %428 {strides = array<i32>} : memref<256x256xf32, #tpu.memory_space<vmem>>, vector<8x256xf32>,
    %c222_i32 = arith.constant 222 : i32
    %430 = tpu.dynamic_rotate %334 by %c222_i32 dim 1 : vector<8x256xf32>, i32 -> vector<8x256xf32>
    %431 = vector.broadcast %330 : vector<1x256xf32> to vector<8x256xf32>
    %432 = arith.mulf %430, %431 : vector<8x256xf32>
    %c192 = arith.constant 192 : index
    %c0_132 = arith.constant 0 : index
    %433 = vector.load %arg5[%c192, %c0_132] : memref<256x256xf32, #tpu.memory_space<vmem>>, vector<8x256xf32>
    tpu.vector_store %arg5[%c192, %c0_132], %432 {strides = array<i32>} : memref<256x256xf32, #tpu.memory_space<vmem>>, vector<8x256xf32>,
    %c0_133 = arith.constant 0 : index
    %c0_134 = arith.constant 0 : index
    %434 = vector.load %arg5[%c0_133, %c0_134] : memref<256x256xf32, #tpu.memory_space<vmem>>, vector<256x256xf32>
    %cst = arith.constant dense<0.000000e+00> : vector<8x256xf32>
    %435 = tpu.matmul %331, %434, %cst {dimension_numbers = #tpu.dot_dimension_numbers<[1], [0], [0], [1], [0, 0, 1, 1], [], []>} : vector<8x256xf32>, vector<256x256xf32>, vector<8x256xf32> -> vector<8x256xf32>
    %436 = vector.broadcast %332 : vector<8x1xf32> to vector<8x256xf32>
    %437 = arith.addf %435, %436 : vector<8x256xf32>
    %c0_135 = arith.constant 0 : index
    %c0_136 = arith.constant 0 : index
    %c0_137 = arith.constant 0 : index
    %438 = vector.load %arg4[%c0_135, %c0_136, %c0_137] : memref<1x8x256xf32, #tpu.memory_space<vmem>>, vector<1x8x256xf32>
    %439 = vector.shape_cast %438 : vector<1x8x256xf32> to vector<8x256xf32>
    %440 = vector.shape_cast %437 : vector<8x256xf32> to vector<1x8x256xf32>
    tpu.vector_store %arg4[%c0_135, %c0_136, %c0_137], %440 {strides = array<i32>} : memref<1x8x256xf32, #tpu.memory_space<vmem>>, vector<1x8x256xf32>,
    return
  }
  func.func @transform_0(%arg0: i32) -> (i32, i32, i32) {
    %c0_i32 = arith.constant 0 : i32
    %c0_i32_0 = arith.constant 0 : i32
    %c0_i32_1 = arith.constant 0 : i32
    return %arg0, %c0_i32, %c0_i32_0 : i32, i32, i32
  }
  func.func @transform_1(%arg0: i32) -> (i32, i32) {
    %c0_i32 = arith.constant 0 : i32
    %c0_i32_0 = arith.constant 0 : i32
    %c0_i32_1 = arith.constant 0 : i32
    return %c0_i32, %c0_i32_0 : i32, i32
  }
  func.func @transform_2(%arg0: i32) -> (i32, i32) {
    %c0_i32 = arith.constant 0 : i32
    %c0_i32_0 = arith.constant 0 : i32
    %c0_i32_1 = arith.constant 0 : i32
    return %c0_i32, %c0_i32_0 : i32, i32
  }
  func.func @transform_3(%arg0: i32) -> (i32, i32, i32) {
    %c0_i32 = arith.constant 0 : i32
    %c0_i32_0 = arith.constant 0 : i32
    %c0_i32_1 = arith.constant 0 : i32
    return %arg0, %c0_i32, %c0_i32_0 : i32, i32, i32
  }
}

</mosaic_0001>

<bundles_post_ra>
// kernel: tpu_custom_call.1
= control target key start
LH: loop header
LB: loop body
LE: loop exit
PB: predicated region body
PF: predicated region fallthrough
CT: control target
= control target key end

     0   :  { %8 = vsyncpa [#allocation4], 0  ;;  %s1173_s0 = inlined_call_operand.hbm [shape: f32[1,8,256], index: 0, kind: input, shape index: {}]   ;;  %s1174_s1 = inlined_call_operand.hbm [shape: f32[8,256], index: 1, kind: input, shape index: {}]   ;;  %s1175_s2 = inlined_call_operand.vmem [shape: f32[8,1], index: 2, kind: input, shape index: {}]   ;;  %s1176_s3 = inlined_call_operand.hbm [shape: f32[1,8,256], index: 3, kind: output, shape index: {}]  }
   0x1   :  { %9 = vsyncpa [#allocation7], 0 }
   0x2   :  { %10 = vsyncpa [#allocation5], 0  ;;  %s847_s12 = smov [#allocation3]   ;;  %s848_s14 = smov [#allocation6]  }
   0x3   :  { %s17_s13 = sshll.u32 %s847_s12, 4  ;;  %s27_s15 = sshll.u32 %s848_s14, 4  ;;  %s18_s13 = int_to_ptr.vmem [resolvable:$true] %s17_s13  ;;  %s28_s15 = int_to_ptr.vmem [resolvable:$true] %s27_s15 }
   0x4   :  { %s789_s16 = scalar_lea.vmem %s18_s13, 256  ;;  %p794_p1 = scmp.lt.s32.totalorder %s18_s13, %s18_s13 }
   0x5   :  { %p790_p0 = scmp.ne.s32.totalorder %s18_s13, %s789_s16  ;;  %p795_p2 = scmp.lt.s32.totalorder %s789_s16, %s789_s16 }
   0x7   :  { %p796_p3 = por %p795_p2, %p794_p1 }
   0x9   :  { %p797_p4 = pnand %p796_p3, %p790_p0 }
   0xb   :  { %800 = shalt.err (!%p797_p4)
}
   0xc   :  { %20 = dma.hbm_to_vmem [thread:$0]  %s1173_s0, 256, %s18_s13, [#allocation4]  }
   0xd   :  { %s809_s19 = scalar_lea.vmem %s28_s15, 256  ;;  %p814_p6 = scmp.lt.s32.totalorder %s28_s15, %s28_s15 }
   0xe   :  { %p810_p5 = scmp.ne.s32.totalorder %s28_s15, %s809_s19  ;;  %p815_p7 = scmp.lt.s32.totalorder %s809_s19, %s809_s19 }
  0x10   :  { %p816_p8 = por %p815_p7, %p814_p6 }
  0x12   :  { %p817_p9 = pnand %p816_p8, %p810_p5 }
  0x14   :  { %820 = shalt.err (!%p817_p9)
}
  0x15   :  { %30 = dma.hbm_to_vmem [thread:$0]  %s1174_s1, 256, %s28_s15, [#allocation7]  }
  0x16   :  { %841 = dma.done.wait [#allocation4], 256  }
  0x17   :  { %842 = vsyncadd [#allocation4], 4294967040 }
  0x18   :  { %843 = dma.done.wait [#allocation7], 256  }
  0x19   :  { %844 = vsyncadd [#allocation7], 4294967040  ;;  %v902_v0 = vld [vmem:[#allocation3] sm:$0xff]  ;;  %s849_s22 = smov 126   ;;  %s850_s0 = smov 114   ;;  %v906_v1 = vld [vmem:[#allocation3 + $0x8] sm:$0xff]  ;;  %v57_v5 = vlaneseq }
  0x1a   :  { %428 = vrot.lane.b32.xlu1 %v902_v0, %s849_s22  ;;  %439 = vrot.lane.b32.xlu0 %v902_v0, %s850_s0  ;;  %s851_s23 = smov 127   ;;  %s852_s1 = smov 1   ;;  %v277_v2 = vld [vmem:[#allocation6 + $0x8] sm:$0xff]  ;;  %v871_v3 = vmov 0   ;;  %v278_v4 = vld [vmem:[%s1175_s2] sm:$0xff]  ;;  %v874_v12 = vmov 0.0  }
  0x1b   :  { %s853_s24 = smov 2   ;;  %s854_s25 = smov 14   ;;  %682 = vmatprep.mubr.f32.mxu0 %v277_v2  ;;  %780 = vset.pattern.permute.xlu0 %v871_v3  ;;  %v957_v6 = vand.u32 127, %v57_v5 }
  0x1c   :  { %s855_s26 = smov 15   ;;  %s856_s27 = smov 16  }
  0x1d   :  { %s857_s28 = smov 17   ;;  %s858_s29 = smov 18   ;;  %v960_v7 = vadd.s32 128, %v957_v6  ;;  %v966_v9 = vand.u32 15, %v957_v6  ;;  %vm432_vm5 = vcmp.lt.s32.totalorder %v957_v6, 126  ;;  %vm443_vm6 = vcmp.lt.s32.totalorder %v957_v6, 114 }
  0x1e   :  { %430 = vrot.lane.b32.xlu1 %v906_v1, %s849_s22  ;;  %441 = vrot.lane.b32.xlu0 %v906_v1, %s850_s0  ;;  %s859_s30 = smov 30   ;;  %s860_s4 = smov 31   ;;  %vm421_vm10 = vcmp.lt.s32.totalorder %v957_v6, 127  ;;  %vm406_vm13 = vcmp.lt.s32.totalorder %v957_v6, 1  ;;  %vm116_vm14 = vcmp.ge.s32.totalorder %v957_v6, 16  ;;  %vm395_vm15 = vcmp.lt.s32.totalorder %v957_v6, 2 }
  0x1f   :  { %s861_s5 = smov 32   ;;  %s862_s6 = smov 33   ;;  %v963_v8 = vand.u32 15, %v960_v7  ;;  %vm197_vm1 = vcmp.lt.s32.totalorder %v960_v7, 240  ;;  %vm68_vm3 = vcmp.ge.s32.totalorder %v966_v9, 2  ;;  %vm108_vm7 = vcmp.lt.s32.totalorder %v966_v9, 14 }
  0x20   :  { %s863_s7 = smov 34   ;;  %s864_s8 = smov 94   ;;  %v983_v14 = vsel %vm68_vm3, 1.0, %v874_v12  ;;  %vm100_vm8 = vcmp.lt.s32.totalorder %v966_v9, 15  ;;  %v998_v21 = vsel %vm108_vm7, 1.0, %v874_v12  ;;  %vm80_vm11 = vcmp.ge.s32.totalorder %v966_v9, 1 }
  0x21   :  { %s865_s9 = smov 95   ;;  %s866_s10 = smov 96   ;;  %vm69_vm0 = vcmp.ge.s32.totalorder %v963_v8, 2  ;;  %vm109_vm4 = vcmp.lt.s32.totalorder %v963_v8, 14  ;;  %vm101_vm9 = vcmp.lt.s32.totalorder %v963_v8, 15  ;;  %v1011_v26 = vsel %vm100_vm8, 1.0, %v874_v12 }
  0x22   :  { %419 = vrot.lane.b32.xlu1 %v906_v1, %s851_s23  ;;  %417 = vrot.lane.b32.xlu0 %v902_v0, %s851_s23  ;;  %s867_s11 = smov 97   ;;  %s868_s12 = smov 98   ;;  %vm201_vm2 = vmand %vm197_vm1, %vm69_vm0  ;;  %v991_v17 = vsel %vm109_vm4, 1.0, %v874_v12  ;;  %v1006_v25 = vsel %vm101_vm9, 1.0, %v874_v12  ;;  %vm81_vm12 = vcmp.ge.s32.totalorder %v963_v8, 1  ;;  %v1032_v36 = vsel %vm80_vm11, 1.0, %v874_v12 }
  0x23   :  { %s869_s13 = smov 110   ;;  %s870_s14 = smov 111   ;;  %v734_v13 = vsel %vm201_vm2, 1.0, %v874_v12  ;;  %v1027_v35 = vsel %vm81_vm12, 1.0, %v874_v12  ;;  %v1043_v43 = vsel %vm69_vm0, 1.0, %v874_v12  ;;  %vm150_vm2 = vmand %vm116_vm14, %vm108_vm7 }
  0x24   :  { %s872_s15 = smov 112   ;;  %s873_s16 = smov 113   ;;  %v723_v50 = vsel %vm150_vm2, 1.0, %v874_v12  ;;  %vm351_vm2 = vcmp.lt.s32.totalorder %v957_v6, 17 }
  0x25   :  { %s875_s2 = smov [#allocation8]  }
  0x26   :  { %404 = vrot.lane.b32.xlu1 %v906_v1, %s852_s1  ;;  %402 = vrot.lane.b32.xlu0 %v902_v0, %s852_s1  ;;  %s697_s19 = sshll.u32 %s875_s2, 4  ;;  %s698_s19 = int_to_ptr.vmem [resolvable:$true] %s697_s19 }
  0x27   :  { %s821_s20 = scalar_lea.vmem %s698_s19, 256  ;;  %p826_p11 = scmp.lt.s32.totalorder %s698_s19, %s698_s19 }
  0x28   :  { %p822_p10 = scmp.ne.s32.totalorder %s698_s19, %s821_s20  ;;  %p827_p12 = scmp.lt.s32.totalorder %s821_s20, %s821_s20 }
  0x2a   :  { %393 = vrot.lane.b32.xlu1 %v906_v1, %s853_s24  ;;  %391 = vrot.lane.b32.xlu0 %v902_v0, %s853_s24  ;;  %p828_p13 = por %p827_p12, %p826_p11 }
  0x2c   :  { %p829_p0 = pnand %p828_p13, %p822_p10 }
  0x2e   :  { %382 = vrot.lane.b32.xlu1 %v906_v1, %s854_s25  ;;  %380 = vrot.lane.b32.xlu0 %v902_v0, %s854_s25 }
  0x32   :  { %371 = vrot.lane.b32.xlu1 %v906_v1, %s855_s26  ;;  %369 = vrot.lane.b32.xlu0 %v902_v0, %s855_s26 }
  0x36   :  { %360 = vrot.lane.b32.xlu1 %v906_v1, %s856_s27  ;;  %358 = vrot.lane.b32.xlu0 %v902_v0, %s856_s27 }
  0x3a   :  { %349 = vrot.lane.b32.xlu1 %v906_v1, %s857_s28  ;;  %347 = vrot.lane.b32.xlu0 %v902_v0, %s857_s28 }
  0x3e   :  { %338 = vrot.lane.b32.xlu1 %v906_v1, %s858_s29  ;;  %336 = vrot.lane.b32.xlu0 %v902_v0, %s858_s29 }
  0x42   :  { %327 = vrot.lane.b32.xlu1 %v906_v1, %s859_s30  ;;  %325 = vrot.lane.b32.xlu0 %v902_v0, %s859_s30 }
  0x46   :  { %316 = vrot.lane.b32.xlu1 %v906_v1, %s860_s4  ;;  %314 = vrot.lane.b32.xlu0 %v902_v0, %s860_s4 }
  0x4a   :  { %305 = vrot.lane.b32.xlu1 %v906_v1, %s861_s5  ;;  %303 = vrot.lane.b32.xlu0 %v902_v0, %s861_s5 }
  0x4e   :  { %294 = vrot.lane.b32.xlu1 %v906_v1, %s862_s6  ;;  %292 = vrot.lane.b32.xlu0 %v902_v0, %s862_s6 }
  0x52   :  { %283 = vrot.lane.b32.xlu1 %v906_v1, %s863_s7  ;;  %281 = vrot.lane.b32.xlu0 %v902_v0, %s863_s7 }
  0x56   :  { %540 = vrot.lane.b32.xlu1 %v906_v1, %s864_s8  ;;  %538 = vrot.lane.b32.xlu0 %v902_v0, %s864_s8 }
  0x5a   :  { %529 = vrot.lane.b32.xlu1 %v906_v1, %s865_s9  ;;  %527 = vrot.lane.b32.xlu0 %v902_v0, %s865_s9 }
  0x5e   :  { %518 = vrot.lane.b32.xlu1 %v906_v1, %s866_s10  ;;  %516 = vrot.lane.b32.xlu0 %v902_v0, %s866_s10 }
  0x62   :  { %507 = vrot.lane.b32.xlu1 %v906_v1, %s867_s11  ;;  %505 = vrot.lane.b32.xlu0 %v902_v0, %s867_s11 }
  0x66   :  { %496 = vrot.lane.b32.xlu1 %v906_v1, %s868_s12  ;;  %494 = vrot.lane.b32.xlu0 %v902_v0, %s868_s12 }
  0x6a   :  { %485 = vrot.lane.b32.xlu1 %v906_v1, %s869_s13  ;;  %483 = vrot.lane.b32.xlu0 %v902_v0, %s869_s13 }
  0x6e   :  { %474 = vrot.lane.b32.xlu1 %v906_v1, %s870_s14  ;;  %472 = vrot.lane.b32.xlu0 %v902_v0, %s870_s14 }
  0x72   :  { %463 = vrot.lane.b32.xlu1 %v906_v1, %s872_s15  ;;  %461 = vrot.lane.b32.xlu0 %v902_v0, %s872_s15 }
  0x76   :  { %452 = vrot.lane.b32.xlu1 %v906_v1, %s873_s16  ;;  %450 = vrot.lane.b32.xlu0 %v902_v0, %s873_s16 }
  0x7a   :  { %615 = vperm.xlu0 %780, %v278_v4  }
  0x8c   :  { %v429_v10 = vpop.permute.xlu1 %428  ;;  %v440_v11 = vpop.permute.xlu0 %439 }
  0x90   :  { %v431_v15 = vpop.permute.xlu1 %430  ;;  %v442_v16 = vpop.permute.xlu0 %441 }
  0x91   :  { %v434_v18 = vsel %vm432_vm5, %v431_v15, %v429_v10  ;;  %v444_v19 = vsel %vm443_vm6, %v440_v11, %v442_v16  ;;  %v445_v20 = vsel %vm443_vm6, %v442_v16, %v440_v11  ;;  %v433_v22 = vsel %vm432_vm5, %v429_v10, %v431_v15  ;;  %vm144_vm6 = vmand %vm116_vm14, %vm100_vm8 }
  0x92   :  { %v447_v23 = vmul.f32 %v734_v13, %v445_v20  ;;  %v446_v24 = vmul.f32 %v983_v14, %v444_v19  ;;  %v436_v27 = vmul.f32 %v991_v17, %v434_v18  ;;  %v435_v30 = vmul.f32 %v998_v21, %v433_v22 }
  0x93   :  { %vm384_vm5 = vcmp.lt.s32.totalorder %v957_v6, 14  ;;  %v721_v57 = vsel %vm144_vm6, 1.0, %v874_v12  ;;  %vm62_vm6 = vcmp.ge.s32.totalorder %v957_v6, 32 }
  0x94   :  { %v420_v28 = vpop.permute.xlu1 %419  ;;  %618 = vmatprep.subr.mxu0 %v447_v23  ;;  %v418_v29 = vpop.permute.xlu0 %417 }
  0x95   :  { %v422_v31 = vsel %vm421_vm10, %v418_v29, %v420_v28  ;;  %v423_v32 = vsel %vm421_vm10, %v420_v28, %v418_v29  ;;  %619 = vmatpush1.msra.mxu0 %v446_v24  ;;  %vm373_vm10 = vcmp.lt.s32.totalorder %v957_v6, 15 }
  0x96   :  { %v424_v33 = vmul.f32 %v1011_v26, %v422_v31  ;;  %v425_v34 = vmul.f32 %v1006_v25, %v423_v32  ;;  %620 = vmatprep.subr.mxu0 %v436_v27 }
  0x97   :  { %621 = vmatpush1.msra.mxu0 %v435_v30 }
  0x98   :  { %v405_v37 = vpop.permute.xlu1 %404  ;;  %622 = vmatprep.subr.mxu0 %v425_v34  ;;  %v403_v38 = vpop.permute.xlu0 %402 }
  0x99   :  { %v407_v39 = vsel %vm406_vm13, %v403_v38, %v405_v37  ;;  %v408_v40 = vsel %vm406_vm13, %v405_v37, %v403_v38  ;;  %623 = vmatpush1.msra.mxu0 %v424_v33  ;;  %vm362_vm13 = vcmp.lt.s32.totalorder %v957_v6, 16 }
  0x9a   :  { %v409_v41 = vmul.f32 %v1032_v36, %v408_v40  ;;  %v410_v42 = vmul.f32 %v1027_v35, %v407_v39  ;;  %624 = vmatprep.subr.mxu0 %v906_v1 }
  0x9b   :  { %625 = vmatpush1.msra.mxu0 %v902_v0  ;;  %v720_v0 = vsel %vm116_vm14, 1.0, %v874_v12 }
  0x9c   :  { %v394_v44 = vpop.permute.xlu1 %393  ;;  %626 = vmatprep.subr.mxu0 %v410_v42  ;;  %v392_v45 = vpop.permute.xlu0 %391 }
  0x9d   :  { %v396_v46 = vsel %vm395_vm15, %v392_v45, %v394_v44  ;;  %v397_v47 = vsel %vm395_vm15, %v394_v44, %v392_v45  ;;  %627 = vmatpush1.msra.mxu0 %v409_v41  ;;  %vm128_vm15 = vmand %vm116_vm14, %vm80_vm11 }
  0x9e   :  { %v398_v48 = vmul.f32 %v983_v14, %v397_v47  ;;  %v399_v49 = vmul.f32 %v1043_v43, %v396_v46  ;;  %v718_v10 = vsel %vm128_vm15, 1.0, %v874_v12  ;;  %vm102_vm15 = vmand %vm62_vm6, %vm100_vm8  ;;  %vm307_vm8 = vcmp.lt.s32.totalorder %v957_v6, 32 }
  0x9f   :  { %v712_v39 = vsel %vm102_vm15, 1.0, %v874_v12  ;;  %v711_v47 = vsel %vm62_vm6, 1.0, %v874_v12  ;;  %vm531_vm15 = vcmp.lt.s32.totalorder %v957_v6, 95 }
  0xa0   :  { %v383_v51 = vpop.permute.xlu1 %382  ;;  %628 = vmatprep.subr.mxu0 %v399_v49  ;;  %v381_v52 = vpop.permute.xlu0 %380 }
  0xa1   :  { %v385_v53 = vsel %vm384_vm5, %v381_v52, %v383_v51  ;;  %v386_v54 = vsel %vm384_vm5, %v383_v51, %v381_v52  ;;  %629 = vmatpush1.msra.mxu0 %v398_v48  ;;  %vm120_vm5 = vmand %vm116_vm14, %vm68_vm3  ;;  %vm329_vm14 = vcmp.lt.s32.totalorder %v957_v6, 30 }
  0xa2   :  { %v387_v55 = vmul.f32 %v723_v50, %v386_v54  ;;  %v388_v56 = vmul.f32 %v991_v17, %v385_v53  ;;  %v716_v20 = vsel %vm120_vm5, 1.0, %v874_v12  ;;  %vm296_vm5 = vcmp.lt.s32.totalorder %v957_v6, 33 }
  0xa4   :  { %v372_v58 = vpop.permute.xlu1 %371  ;;  %630 = vmatprep.subr.mxu0 %v388_v56  ;;  %v370_v59 = vpop.permute.xlu0 %369 }
  0xa5   :  { %v374_v60 = vsel %vm373_vm10, %v370_v59, %v372_v58  ;;  %v375_v61 = vsel %vm373_vm10, %v372_v58, %v370_v59  ;;  %631 = vmatpush1.msra.mxu0 %v387_v55  ;;  %vm340_vm10 = vcmp.lt.s32.totalorder %v957_v6, 18 }
  0xa6   :  { %v376_v62 = vmul.f32 %v721_v57, %v375_v61  ;;  %v377_v63 = vmul.f32 %v1006_v25, %v374_v60 }
  0xa8   :  { %v361_v1 = vpop.permute.xlu1 %360  ;;  %632 = vmatprep.subr.mxu0 %v377_v63  ;;  %v359_v2 = vpop.permute.xlu0 %358 }
  0xa9   :  { %v364_v3 = vsel %vm362_vm13, %v361_v1, %v359_v2  ;;  %633 = vmatpush1.msra.mxu0 %v376_v62  ;;  %v363_v4 = vsel %vm362_vm13, %v359_v2, %v361_v1  ;;  %vm110_vm13 = vmand %vm62_vm6, %vm108_vm7  ;;  %vm318_vm7 = vcmp.lt.s32.totalorder %v957_v6, 31 }
  0xaa   :  { %v365_v5 = vmul.f32 %v720_v0, %v364_v3  ;;  %634 = vmatprep.subr.mxu0 %v363_v4  ;;  %v714_v30 = vsel %vm110_vm13, 1.0, %v874_v12  ;;  %vm285_vm13 = vcmp.lt.s32.totalorder %v957_v6, 34 }
  0xac   :  { %v350_v11 = vpop.permute.xlu1 %349  ;;  %635 = vmatpush1.msra.mxu0 %v365_v5  ;;  %v348_v13 = vpop.permute.xlu0 %347 }
  0xad   :  { %v352_v15 = vsel %vm351_vm2, %v348_v13, %v350_v11  ;;  %v353_v16 = vsel %vm351_vm2, %v350_v11, %v348_v13  ;;  %vm82_vm2 = vmand %vm62_vm6, %vm80_vm11  ;;  %vm237_vm11 = vcmp.lt.s32.totalorder %v960_v7, 224 }
  0xae   :  { %v354_v18 = vmul.f32 %v718_v10, %v353_v16  ;;  %v355_v19 = vmul.f32 %v1027_v35, %v352_v15 }
  0xb0   :  { %v339_v22 = vpop.permute.xlu1 %338  ;;  %636 = vmatprep.subr.mxu0 %v355_v19  ;;  %v337_v23 = vpop.permute.xlu0 %336  ;;  %v746_v19 = vsel %vm237_vm11, 1.0, %v874_v12 }
  0xb1   :  { %v341_v24 = vsel %vm340_vm10, %v337_v23, %v339_v22  ;;  %v342_v27 = vsel %vm340_vm10, %v339_v22, %v337_v23  ;;  %637 = vmatpush1.msra.mxu0 %v354_v18  ;;  %vm70_vm10 = vmand %vm62_vm6, %vm68_vm3  ;;  %vm542_vm3 = vcmp.lt.s32.totalorder %v957_v6, 94 }
  0xb2   :  { %v343_v28 = vmul.f32 %v716_v20, %v342_v27  ;;  %v344_v29 = vmul.f32 %v1043_v43, %v341_v24  ;;  %v707_v58 = vsel %vm70_vm10, 1.0, %v874_v12  ;;  %vm265_vm6 = vmand %vm237_vm11, %vm101_vm9  ;;  %vm498_vm10 = vcmp.lt.s32.totalorder %v957_v6, 98 }
  0xb4   :  { %v328_v31 = vpop.permute.xlu1 %327  ;;  %638 = vmatprep.subr.mxu0 %v344_v29  ;;  %v326_v32 = vpop.permute.xlu0 %325 }
  0xb5   :  { %v330_v33 = vsel %vm329_vm14, %v326_v32, %v328_v31  ;;  %v331_v34 = vsel %vm329_vm14, %v328_v31, %v326_v32  ;;  %639 = vmatpush1.msra.mxu0 %v343_v28  ;;  %vm271_vm14 = vmand %vm237_vm11, %vm109_vm4 }
  0xb6   :  { %v332_v37 = vmul.f32 %v714_v30, %v331_v34  ;;  %v333_v38 = vmul.f32 %v991_v17, %v330_v33 }
  0xb8   :  { %v317_v40 = vpop.permute.xlu1 %316  ;;  %640 = vmatprep.subr.mxu0 %v333_v38  ;;  %v315_v41 = vpop.permute.xlu0 %314 }
  0xb9   :  { %v319_v42 = vsel %vm318_vm7, %v315_v41, %v317_v40  ;;  %v320_v44 = vsel %vm318_vm7, %v317_v40, %v315_v41  ;;  %641 = vmatpush1.msra.mxu0 %v332_v37  ;;  %vm520_vm7 = vcmp.lt.s32.totalorder %v957_v6, 96 }
  0xba   :  { %v321_v45 = vmul.f32 %v712_v39, %v320_v44  ;;  %v322_v46 = vmul.f32 %v1006_v25, %v319_v42  ;;  %v709_v25 = vsel %vm82_vm2, 1.0, %v874_v12  ;;  %vm509_vm2 = vcmp.lt.s32.totalorder %v957_v6, 97 }
  0xbc   :  { %v306_v17 = vpop.permute.xlu1 %305  ;;  %642 = vmatprep.subr.mxu0 %v322_v46  ;;  %v304_v48 = vpop.permute.xlu0 %303 }
  0xbd   :  { %v309_v49 = vsel %vm307_vm8, %v306_v17, %v304_v48  ;;  %643 = vmatpush1.msra.mxu0 %v321_v45  ;;  %v308_v50 = vsel %vm307_vm8, %v304_v48, %v306_v17  ;;  %vm249_vm8 = vmand %vm237_vm11, %vm81_vm12 }
  0xbe   :  { %v310_v51 = vmul.f32 %v711_v47, %v309_v49  ;;  %644 = vmatprep.subr.mxu0 %v308_v50  ;;  %v745_v27 = vsel %vm249_vm8, 1.0, %v874_v12 }
  0xc0   :  { %v295_v52 = vpop.permute.xlu1 %294  ;;  %645 = vmatpush1.msra.mxu0 %v310_v51  ;;  %v293_v53 = vpop.permute.xlu0 %292 }
  0xc1   :  { %v297_v54 = vsel %vm296_vm5, %v293_v53, %v295_v52  ;;  %v298_v55 = vsel %vm296_vm5, %v295_v52, %v293_v53  ;;  %vm241_vm5 = vmand %vm237_vm11, %vm69_vm0  ;;  %vm487_vm0 = vcmp.lt.s32.totalorder %v957_v6, 110 }
  0xc2   :  { %v299_v56 = vmul.f32 %v709_v25, %v298_v55  ;;  %v300_v57 = vmul.f32 %v1027_v35, %v297_v54  ;;  %v750_v35 = vsel %vm271_vm14, 1.0, %v874_v12  ;;  %v743_v37 = vsel %vm241_vm5, 1.0, %v874_v12  ;;  %vm225_vm11 = vmand %vm197_vm1, %vm101_vm9 }
  0xc3   :  { %vm465_vm9 = vcmp.lt.s32.totalorder %v957_v6, 112  ;;  %vm209_vm14 = vmand %vm197_vm1, %vm81_vm12 }
  0xc4   :  { %v284_v59 = vpop.permute.xlu1 %283  ;;  %646 = vmatprep.subr.mxu0 %v300_v57  ;;  %v282_v60 = vpop.permute.xlu0 %281 }
  0xc5   :  { %v286_v9 = vsel %vm285_vm13, %v282_v60, %v284_v59  ;;  %v287_v61 = vsel %vm285_vm13, %v284_v59, %v282_v60  ;;  %647 = vmatpush1.msra.mxu0 %v299_v56  ;;  %vm231_vm13 = vmand %vm197_vm1, %vm109_vm4  ;;  %vm476_vm4 = vcmp.lt.s32.totalorder %v957_v6, 111 }
  0xc6   :  { %v288_v62 = vmul.f32 %v707_v58, %v287_v61  ;;  %v289_v63 = vmul.f32 %v1043_v43, %v286_v9  ;;  %v748_v43 = vsel %vm265_vm6, 1.0, %v874_v12  ;;  %v741_v45 = vsel %vm231_vm13, 1.0, %v874_v12 }
  0xc8   :  { %v541_v0 = vpop.permute.xlu1 %540  ;;  %648 = vmatprep.subr.mxu0 %v289_v63  ;;  %v539_v1 = vpop.permute.xlu0 %538 }
  0xc9   :  { %v543_v2 = vsel %vm542_vm3, %v539_v1, %v541_v0  ;;  %v544_v3 = vsel %vm542_vm3, %v541_v0, %v539_v1  ;;  %649 = vmatpush1.msra.mxu0 %v288_v62  ;;  %vm454_vm3 = vcmp.lt.s32.totalorder %v957_v6, 113  ;;  %v276_v0 = vld [vmem:[#allocation6] sm:$0xff] }
  0xca   :  { %v545_v4 = vmul.f32 %v998_v21, %v543_v2  ;;  %v546_v5 = vmul.f32 %v750_v35, %v544_v3 }
  0xcc   :  { %v530_v10 = vpop.permute.xlu1 %529  ;;  %664 = vmatprep.subr.mxu0 %v546_v5  ;;  %v528_v11 = vpop.permute.xlu0 %527 }
  0xcd   :  { %v532_v13 = vsel %vm531_vm15, %v528_v11, %v530_v10  ;;  %v533_v15 = vsel %vm531_vm15, %v530_v10, %v528_v11  ;;  %665 = vmatpush2.msra.mxu0 %v545_v4 }
  0xce   :  { %v534_v16 = vmul.f32 %v1011_v26, %v532_v13  ;;  %v535_v18 = vmul.f32 %v748_v43, %v533_v15 }
  0xd0   :  { %v519_v20 = vpop.permute.xlu1 %518  ;;  %666 = vmatprep.subr.mxu0 %v535_v18  ;;  %v517_v22 = vpop.permute.xlu0 %516 }
  0xd1   :  { %v522_v23 = vsel %vm520_vm7, %v519_v20, %v517_v22  ;;  %667 = vmatpush2.msra.mxu0 %v534_v16  ;;  %v521_v30 = vsel %vm520_vm7, %v517_v22, %v519_v20 }
  0xd2   :  { %v524_v24 = vmul.f32 %v746_v19, %v522_v23 }
  0xd4   :  { %v508_v28 = vpop.permute.xlu1 %507  ;;  %668 = vmatprep.subr.mxu0 %v524_v24  ;;  %v506_v29 = vpop.permute.xlu0 %505 }
  0xd5   :  { %v510_v31 = vsel %vm509_vm2, %v506_v29, %v508_v28  ;;  %v511_v32 = vsel %vm509_vm2, %v508_v28, %v506_v29  ;;  %669 = vmatpush2.msra.mxu0 %v521_v30 }
  0xd6   :  { %v512_v33 = vmul.f32 %v1032_v36, %v510_v31  ;;  %v513_v34 = vmul.f32 %v745_v27, %v511_v32 }
  0xd8   :  { %v497_v38 = vpop.permute.xlu1 %496  ;;  %670 = vmatprep.subr.mxu0 %v513_v34  ;;  %v495_v39 = vpop.permute.xlu0 %494 }
  0xd9   :  { %v499_v40 = vsel %vm498_vm10, %v495_v39, %v497_v38  ;;  %v500_v41 = vsel %vm498_vm10, %v497_v38, %v495_v39  ;;  %671 = vmatpush2.msra.mxu0 %v512_v33 }
  0xda   :  { %v501_v42 = vmul.f32 %v983_v14, %v499_v40  ;;  %v502_v44 = vmul.f32 %v743_v37, %v500_v41  ;;  %v739_v14 = vsel %vm225_vm11, 1.0, %v874_v12 }
  0xdc   :  { %v486_v46 = vpop.permute.xlu1 %485  ;;  %672 = vmatprep.subr.mxu0 %v502_v44  ;;  %v484_v47 = vpop.permute.xlu0 %483 }
  0xdd   :  { %v488_v17 = vsel %vm487_vm0, %v484_v47, %v486_v46  ;;  %v489_v48 = vsel %vm487_vm0, %v486_v46, %v484_v47  ;;  %673 = vmatpush2.msra.mxu0 %v501_v42 }
  0xde   :  { %v490_v49 = vmul.f32 %v998_v21, %v488_v17  ;;  %v491_v50 = vmul.f32 %v741_v45, %v489_v48  ;;  %v737_v21 = vsel %vm197_vm1, 1.0, %v874_v12 }
  0xe0   :  { %v475_v51 = vpop.permute.xlu1 %474  ;;  %674 = vmatprep.subr.mxu0 %v491_v50  ;;  %v473_v25 = vpop.permute.xlu0 %472 }
  0xe1   :  { %v477_v52 = vsel %vm476_vm4, %v473_v25, %v475_v51  ;;  %v478_v53 = vsel %vm476_vm4, %v475_v51, %v473_v25  ;;  %675 = vmatpush2.msra.mxu0 %v490_v49 }
  0xe2   :  { %v479_v54 = vmul.f32 %v1011_v26, %v477_v52  ;;  %v480_v55 = vmul.f32 %v739_v14, %v478_v53  ;;  %v736_v26 = vsel %vm209_vm14, 1.0, %v874_v12 }
  0xe4   :  { %v464_v56 = vpop.permute.xlu1 %463  ;;  %676 = vmatprep.subr.mxu0 %v480_v55  ;;  %v462_v57 = vpop.permute.xlu0 %461 }
  0xe5   :  { %v467_v58 = vsel %vm465_vm9, %v464_v56, %v462_v57  ;;  %677 = vmatpush2.msra.mxu0 %v479_v54  ;;  %v466_v61 = vsel %vm465_vm9, %v462_v57, %v464_v56 }
  0xe6   :  { %v469_v59 = vmul.f32 %v737_v21, %v467_v58 }
  0xe8   :  { %v453_v60 = vpop.permute.xlu1 %452  ;;  %678 = vmatprep.subr.mxu0 %v469_v59  ;;  %v451_v9 = vpop.permute.xlu0 %450 }
  0xe9   :  { %v455_v62 = vsel %vm454_vm3, %v451_v9, %v453_v60  ;;  %v456_v63 = vsel %vm454_vm3, %v453_v60, %v451_v9  ;;  %679 = vmatpush2.msra.mxu0 %v466_v61 }
  0xea   :  { %v457_v35 = vmul.f32 %v1032_v36, %v455_v62  ;;  %v458_v8 = vmul.f32 %v736_v26, %v456_v63 }
  0xec   :  { %680 = vmatprep.subr.mxu0 %v458_v8 }
  0xed   :  { %681 = vmatpush2.msra.mxu0 %v457_v35 }
  0xee   :  { %683 = vmatmul.mubr.f32.vlgmr.msra.gmra.mxu0 %v276_v0 }
  0xf5   :  { %v616_v7 = vpop.permute.xlu0 %615 }
 0x1ae   :  { %v684_v1 = vpop.f32.mrf.mxu0 }
 0x1af   :  { %v685_v6 = vadd.f32 %v684_v1, %v616_v7 }
 0x1b0   :  { %v686_v12 = vpop.f32.mrf.mxu0 }
 0x1b1   :  { %689 = vst [vmem:[#allocation8] sm:$0xff] %v685_v6  ;;  %v687_v2 = vadd.f32 %v686_v12, %v616_v7 }
 0x1b3   :  { %690 = vst [vmem:[#allocation8 + $0x8] sm:$0xff] %v687_v2 }
 0x1b4   :  { %832 = shalt.err (!%p829_p0)
}
 0x1b5   :  { %700 = dma.vmem_to_hbm [thread:$0]  %s698_s19, 256, %s1176_s3, [#allocation5]  }
 0x1b6   :  { %845 = dma.done.wait [#allocation5], 256  }
 0x1b7   :  { %846 = vsyncadd [#allocation5], 4294967040 }
 0x1b8   :  { %704 = vsyncpa [#allocation4], 1 }
 0x1b9   :  { %705 = vsyncpa [#allocation7], 1 }
 0x1ba   :  { %706 = vsyncpa [#allocation5], 1 }

</bundles_post_ra>
